<compile_context>
chip_gen: v7x
topology: tpu7x:2x2x1
jax: 0.10.0
libtpu: 0.0.40
codegen_flags: <defaults>
</compile_context>

<pallas_src>
import functools

import jax
import jax.numpy as jnp
from jax.experimental import pallas as pl
from jax.experimental.pallas import tpu as pltpu


OUT_PAD = 128   # lane width of the packed head weights / padded output store
B_PAD = 8       # sublane-padded batch for the recurrence (one f32 tile row block)


def _mm_kernel(ids_ref, emb_ref, w_ref, b_ref, out_ref, seq_sc, *,
               n_steps, batch, emb_dim, hidden):
    T, B, E, H = n_steps, batch, emb_dim, hidden

    # ---- fused embedding gather, time-major, batch padded to 8 sublanes ----
    seq_sc[...] = jnp.zeros_like(seq_sc)                      # zero pad rows b >= B
    for t in range(T):
        for b in range(B):
            r = t * B_PAD + b
            seq_sc[r:r + 1, :] = emb_ref[ids_ref[b * T + t]]  # (1, E) dynamic row

    # ---- packed weights (bf16) / biases (f32); all slice starts 16-aligned ----
    w_ih = w_ref[0:E, :]                                  # (E, 4H)
    w_hh = w_ref[E:E + H, :]                              # (H, 4H)
    d_w1 = w_ref[E + H:E + 2 * H, :]                      # (H, OUT_PAD), 6 blocks pre-summed
    w_out = w_ref[E + 2 * H:E + 2 * H + OUT_PAD, :]       # (OUT_PAD, OUT_PAD) = d_w2 @ o_w
    lstm_b = b_ref[0:1, :]                                # (1, 4H)   f32
    d_b1 = b_ref[1:2, :]                                  # (1, OUT_PAD)
    o_b = b_ref[2:3, :]                                   # (1, OUT_PAD) = d_b2 @ o_w + o_b

    # Input projection hoisted out of the recurrence: one MXU pass for all T
    # steps, bias folded in (no per-step broadcast inside the loop).
    x_proj = jnp.dot(seq_sc[...].astype(jnp.bfloat16), w_ih,
                     preferred_element_type=jnp.float32) + lstm_b   # (T*8, 4H) f32

    h = jnp.zeros((B_PAD, H), jnp.float32)
    c = jnp.zeros((B_PAD, H), jnp.float32)
    for t in range(T):                                    # static trip count -> unrolled
        gates = x_proj[t * B_PAD:(t + 1) * B_PAD, :] + jnp.dot(
            h.astype(jnp.bfloat16), w_hh, preferred_element_type=jnp.float32)
        sig = jax.nn.sigmoid(gates)                       # one EUP pass, full (8,128) vreg
        th = jnp.tanh(gates)
        i_g = sig[:, 0 * H:1 * H]                         # PyTorch gate order i, f, g, o
        f_g = sig[:, 1 * H:2 * H]
        g_g = th[:, 2 * H:3 * H]
        o_g = sig[:, 3 * H:4 * H]
        c = f_g * c + i_g * g_g
        h = o_g * jnp.tanh(c)                             # == text_lstm_out[:, -1, :]

    # Head: concat([h]*6) folded into d_w1; dense2 and output layer folded into w_out.
    h1 = jnp.maximum(
        jnp.dot(h.astype(jnp.bfloat16), d_w1, preferred_element_type=jnp.float32)
        + d_b1, 0.0)                                      # (8, 128); lanes >= H stay 0
    out_ref[...] = jnp.dot(h1.astype(jnp.bfloat16), w_out,
                           preferred_element_type=jnp.float32) + o_b


def pack_params(params):
    """One-time packing of the live parameters into kernel-friendly buffers."""
    emb = params['embedding']
    V, E = emb.shape
    H = params['t_whh'].shape[0]
    C = params['o_w'].shape[1]
    assert 4 * H == 128, "gate lane layout assumes 4*H == 128"
    assert H <= OUT_PAD and C <= OUT_PAD and E <= 128

    def pad_rc(w, rows, cols):
        return jnp.pad(w, ((0, rows - w.shape[0]), (0, cols - w.shape[1])))

    # Fold the 6-way concat: context == [text_h]*6  ->  sum the six row blocks.
    d_w1_sum = params['d_w1'].reshape(6, H, H).sum(axis=0)
    # Fold dense2 into the output layer (no nonlinearity between them).
    w_fold = params['d_w2'] @ params['o_w']                       # (H, C)
    b_fold = params['d_b2'] @ params['o_w'] + params['o_b']       # (1, C)

    w_pack = jnp.concatenate([
        params['t_wih'],                        # (E, 4H)
        params['t_whh'],                        # (H, 4H)
        pad_rc(d_w1_sum, H, OUT_PAD),           # (H, OUT_PAD)
        pad_rc(w_fold, OUT_PAD, OUT_PAD),       # (OUT_PAD, OUT_PAD)
    ], axis=0).astype(jnp.bfloat16)

    b_pack = jnp.concatenate([
        params['t_b'],                          # (1, 4H)  (b_ih + b_hh summed)
        pad_rc(params['d_b1'], 1, OUT_PAD),
        pad_rc(b_fold, 1, OUT_PAD),
        jnp.zeros((5, OUT_PAD), jnp.float32),
    ], axis=0)                                  # (8, OUT_PAD) f32

    return {
        'emb3d': emb.reshape(V, 1, E).astype(jnp.float32),   # leading-axis gather layout
        'w_pack': w_pack,
        'b_pack': b_pack,
        'meta': (int(V), int(E), int(H), int(C)),
    }


def forward(packed, text_input, img_input, sound_input, sound2_input,
            brand_input, creative_input):
    # Non-text inputs are accepted for API parity but provably do not influence
    # the forward output (softmax over the size-1 attention-score axis == 1.0).
    del img_input, sound_input, sound2_input, brand_input, creative_input

    V, E, H, C = packed['meta']
    B = text_input.shape[0]
    ids = text_input.reshape(B, -1).astype(jnp.int32)
    T = ids.shape[1]
    assert B <= B_PAD  # TODO(synk): batch-tiled grid for larger B

    w_rows = packed['w_pack'].shape[0]
    kernel = functools.partial(_mm_kernel, n_steps=T, batch=B, emb_dim=E, hidden=H)

    grid_spec = pltpu.PrefetchScalarGridSpec(
        num_scalar_prefetch=1,                  # token ids -> SMEM
        grid=(1,),
        in_specs=[
            pl.BlockSpec((V, 1, E), lambda i, ids_ref: (0, 0, 0)),       # embedding table
            pl.BlockSpec((w_rows, OUT_PAD), lambda i, ids_ref: (0, 0)),  # packed bf16 weights
            pl.BlockSpec((8, OUT_PAD), lambda i, ids_ref: (0, 0)),       # packed f32 biases
        ],
        out_specs=pl.BlockSpec((B_PAD, OUT_PAD), lambda i, ids_ref: (0, 0)),
        scratch_shapes=[pltpu.VMEM((T * B_PAD, E), jnp.float32)],        # gathered seq
    )

    out_padded = pl.pallas_call(
        kernel,
        out_shape=jax.ShapeDtypeStruct((B_PAD, OUT_PAD), jnp.float32),
        grid_spec=grid_spec,
        compiler_params=pltpu.CompilerParams(dimension_semantics=("arbitrary",)),
    )(ids.reshape(-1), packed['emb3d'], packed['w_pack'], packed['b_pack'])
    return out_padded[:B, :C]


def init_params(key, vocab, E, H, img_dim, ds, num_classes,
                brand_classes, creative_classes):
    keys = iter(jax.random.split(key, 64))

    def xav(shape):
        fan_in, fan_out = shape[-2], shape[-1]
        std = (2.0 / (fan_in + fan_out)) ** 0.5
        return std * jax.random.normal(next(keys), shape, jnp.float32)

    def zeros(shape):
        return jnp.zeros(shape, jnp.float32)

    p = {}
    p['embedding'] = jax.random.normal(next(keys), (vocab, E), jnp.float32)
    # Text LSTM: weights stored transposed (in, 4H); gate column order i,f,g,o;
    # biases zero per init_weights() (b_ih + b_hh summed into one row).
    p['t_wih'], p['t_whh'], p['t_b'] = xav((E, 4 * H)), xav((H, 4 * H)), zeros((1, 4 * H))
    # Dense head + output layer (live in the forward).
    p['d_w1'], p['d_b1'] = xav((6 * H, H)), zeros((1, H))
    p['d_w2'], p['d_b2'] = xav((H, H)), zeros((1, H))
    p['o_w'], p['o_b'] = xav((H, num_classes)), zeros((1, num_classes))
    # Remaining module parameters (sound/sound2 LSTMs, image MLP, brand /
    # creative linears, 5 attention blocks) are provably dead in the forward
    # pass; kept only so the parameter dict mirrors the PyTorch module.
    p['s_wih'], p['s_whh'], p['s_b'] = xav((ds, 4 * H)), xav((H, 4 * H)), zeros((1, 4 * H))
    p['s2_wih'], p['s2_whh'], p['s2_b'] = xav((ds, 4 * H)), xav((H, 4 * H)), zeros((1, 4 * H))
    p['img_w1'], p['img_b1'] = xav((img_dim, H)), zeros((1, H))
    p['img_w2'], p['img_b2'] = xav((H, H)), zeros((1, H))
    p['br_w'], p['br_b'] = xav((brand_classes, H)), zeros((1, H))
    p['cr_w'], p['cr_b'] = xav((creative_classes, H)), zeros((1, H))
    p['a_w1'] = jnp.stack([xav((H, H)) for _ in range(5)])
    p['a_b1'] = zeros((5, 1, H))
    p['a_w2'] = jnp.stack([xav((H, H)) for _ in range(5)])
    p['a_b2'] = zeros((5, 1, H))
    p['a_v'] = jnp.stack([xav((1, H)) for _ in range(5)])
    p['a_bv'] = zeros((5, 1, 1))
    return p


if __name__ == "__main__":
    # Small shapes consistent with the module's forward.
    B, T, VOCAB, E = 2, 8, 50, 16
    H = 32                     # lstm_units == dense_units (required by the concat)
    IMG_SHAPE = (4, 4, 4)      # flattened -> img_input_dim = 64
    IMG_DIM = 4 * 4 * 4
    S, DS = 6, 16              # sound seq len / sound_embedding_dim
    NUM_CLASSES, BRAND, CREATIVE = 5, 6, 7

    params = init_params(jax.random.PRNGKey(42), VOCAB, E, H, IMG_DIM, DS,
                         NUM_CLASSES, BRAND, CREATIVE)
    packed = pack_params(params)   # one-time weight packing / algebraic folds

    key = jax.random.PRNGKey(0)
    k1, k2, k3, k4, k5, k6 = jax.random.split(key, 6)
    text = jax.random.randint(k1, (B, T), 0, VOCAB, dtype=jnp.int32)
    img = jax.random.normal(k2, (B,) + IMG_SHAPE, dtype=jnp.float32)
    sound = jax.random.normal(k3, (B, S, DS), dtype=jnp.float32)
    sound2 = jax.random.normal(k4, (B, S, DS), dtype=jnp.float32)
    brand = jax.random.normal(k5, (B, BRAND), dtype=jnp.float32)
    creative = jax.random.normal(k6, (B, CREATIVE), dtype=jnp.float32)

    out = forward(packed, text, img, sound, sound2, brand, creative)
    jax.block_until_ready(out)
    assert out.shape == (B, NUM_CLASSES)
    assert bool(jnp.all(jnp.isfinite(out)))
    print("KERNEL_OK")
</pallas_src>

<mosaic_0001>
module attributes {stable_mosaic.version = 11 : i64} {
  func.func @_mm_kernel(%arg0: i32, %arg1: memref<16xi32, #tpu.memory_space<smem>>, %arg2: memref<50x1x16xf32, #tpu.memory_space<vmem>>, %arg3: memref<208x128xbf16, #tpu.memory_space<vmem>>, %arg4: memref<8x128xf32, #tpu.memory_space<vmem>>, %arg5: memref<8x128xf32, #tpu.memory_space<vmem>>, %arg6: memref<64x16xf32, #tpu.memory_space<vmem>>) attributes {dimension_semantics = [#tpu.dimension_semantics<arbitrary>], iteration_bounds = array<i64: 1>, scalar_prefetch = 1 : i64, scratch_operands = 1 : i64, tpu.core_type = #tpu.core_type<tc>, window_params = [{pipeline_mode = #tpu.pipeline_mode<synchronous>, transform_indices = @transform_0, window_bounds = array<i64: 50, 1, 16>}, {pipeline_mode = #tpu.pipeline_mode<synchronous>, transform_indices = @transform_1, window_bounds = array<i64: 208, 128>}, {pipeline_mode = #tpu.pipeline_mode<synchronous>, transform_indices = @transform_2, window_bounds = array<i64: 8, 128>}, {pipeline_mode = #tpu.pipeline_mode<synchronous>, transform_indices = @transform_3, window_bounds = array<i64: 8, 128>}]} {
    %cst = arith.constant 0.000000e+00 : f32
    %0 = vector.broadcast %cst : f32 to vector<64x16xf32>
    %c0 = arith.constant 0 : index
    %c0_0 = arith.constant 0 : index
    %1 = vector.load %arg6[%c0, %c0_0] : memref<64x16xf32, #tpu.memory_space<vmem>>, vector<64x16xf32>
    tpu.vector_store %arg6[%c0, %c0_0], %0 {strides = array<i32>} : memref<64x16xf32, #tpu.memory_space<vmem>>, vector<64x16xf32>,
    %c0_1 = arith.constant 0 : index
    %2 = memref.load %arg1[%c0_1] : memref<16xi32, #tpu.memory_space<smem>>
    %3 = arith.index_cast %2 : i32 to index
    %c0_2 = arith.constant 0 : index
    %c0_3 = arith.constant 0 : index
    %4 = vector.load %arg2[%3, %c0_2, %c0_3] : memref<50x1x16xf32, #tpu.memory_space<vmem>>, vector<1x1x16xf32>
    %5 = vector.shape_cast %4 : vector<1x1x16xf32> to vector<1x16xf32>
    %c0_4 = arith.constant 0 : index
    %c0_5 = arith.constant 0 : index
    %6 = vector.load %arg6[%c0_4, %c0_5] : memref<64x16xf32, #tpu.memory_space<vmem>>, vector<1x16xf32>
    tpu.vector_store %arg6[%c0_4, %c0_5], %5 {strides = array<i32>} : memref<64x16xf32, #tpu.memory_space<vmem>>, vector<1x16xf32>,
    %c8 = arith.constant 8 : index
    %7 = memref.load %arg1[%c8] : memref<16xi32, #tpu.memory_space<smem>>
    %8 = arith.index_cast %7 : i32 to index
    %c0_6 = arith.constant 0 : index
    %c0_7 = arith.constant 0 : index
    %9 = vector.load %arg2[%8, %c0_6, %c0_7] : memref<50x1x16xf32, #tpu.memory_space<vmem>>, vector<1x1x16xf32>
    %10 = vector.shape_cast %9 : vector<1x1x16xf32> to vector<1x16xf32>
    %c1 = arith.constant 1 : index
    %c0_8 = arith.constant 0 : index
    %11 = vector.load %arg6[%c1, %c0_8] : memref<64x16xf32, #tpu.memory_space<vmem>>, vector<1x16xf32>
    tpu.vector_store %arg6[%c1, %c0_8], %10 {strides = array<i32>} : memref<64x16xf32, #tpu.memory_space<vmem>>, vector<1x16xf32>,
    %c1_9 = arith.constant 1 : index
    %12 = memref.load %arg1[%c1_9] : memref<16xi32, #tpu.memory_space<smem>>
    %13 = arith.index_cast %12 : i32 to index
    %c0_10 = arith.constant 0 : index
    %c0_11 = arith.constant 0 : index
    %14 = vector.load %arg2[%13, %c0_10, %c0_11] : memref<50x1x16xf32, #tpu.memory_space<vmem>>, vector<1x1x16xf32>
    %15 = vector.shape_cast %14 : vector<1x1x16xf32> to vector<1x16xf32>
    %c8_12 = arith.constant 8 : index
    %c0_13 = arith.constant 0 : index
    %16 = vector.load %arg6[%c8_12, %c0_13] : memref<64x16xf32, #tpu.memory_space<vmem>>, vector<1x16xf32>
    tpu.vector_store %arg6[%c8_12, %c0_13], %15 {strides = array<i32>} : memref<64x16xf32, #tpu.memory_space<vmem>>, vector<1x16xf32>,
    %c9 = arith.constant 9 : index
    %17 = memref.load %arg1[%c9] : memref<16xi32, #tpu.memory_space<smem>>
    %18 = arith.index_cast %17 : i32 to index
    %c0_14 = arith.constant 0 : index
    %c0_15 = arith.constant 0 : index
    %19 = vector.load %arg2[%18, %c0_14, %c0_15] : memref<50x1x16xf32, #tpu.memory_space<vmem>>, vector<1x1x16xf32>
    %20 = vector.shape_cast %19 : vector<1x1x16xf32> to vector<1x16xf32>
    %c9_16 = arith.constant 9 : index
    %c0_17 = arith.constant 0 : index
    %21 = vector.load %arg6[%c9_16, %c0_17] : memref<64x16xf32, #tpu.memory_space<vmem>>, vector<1x16xf32>
    tpu.vector_store %arg6[%c9_16, %c0_17], %20 {strides = array<i32>} : memref<64x16xf32, #tpu.memory_space<vmem>>, vector<1x16xf32>,
    %c2 = arith.constant 2 : index
    %22 = memref.load %arg1[%c2] : memref<16xi32, #tpu.memory_space<smem>>
    %23 = arith.index_cast %22 : i32 to index
    %c0_18 = arith.constant 0 : index
    %c0_19 = arith.constant 0 : index
    %24 = vector.load %arg2[%23, %c0_18, %c0_19] : memref<50x1x16xf32, #tpu.memory_space<vmem>>, vector<1x1x16xf32>
    %25 = vector.shape_cast %24 : vector<1x1x16xf32> to vector<1x16xf32>
    %c16 = arith.constant 16 : index
    %c0_20 = arith.constant 0 : index
    %26 = vector.load %arg6[%c16, %c0_20] : memref<64x16xf32, #tpu.memory_space<vmem>>, vector<1x16xf32>
    tpu.vector_store %arg6[%c16, %c0_20], %25 {strides = array<i32>} : memref<64x16xf32, #tpu.memory_space<vmem>>, vector<1x16xf32>,
    %c10 = arith.constant 10 : index
    %27 = memref.load %arg1[%c10] : memref<16xi32, #tpu.memory_space<smem>>
    %28 = arith.index_cast %27 : i32 to index
    %c0_21 = arith.constant 0 : index
    %c0_22 = arith.constant 0 : index
    %29 = vector.load %arg2[%28, %c0_21, %c0_22] : memref<50x1x16xf32, #tpu.memory_space<vmem>>, vector<1x1x16xf32>
    %30 = vector.shape_cast %29 : vector<1x1x16xf32> to vector<1x16xf32>
    %c17 = arith.constant 17 : index
    %c0_23 = arith.constant 0 : index
    %31 = vector.load %arg6[%c17, %c0_23] : memref<64x16xf32, #tpu.memory_space<vmem>>, vector<1x16xf32>
    tpu.vector_store %arg6[%c17, %c0_23], %30 {strides = array<i32>} : memref<64x16xf32, #tpu.memory_space<vmem>>, vector<1x16xf32>,
    %c3 = arith.constant 3 : index
    %32 = memref.load %arg1[%c3] : memref<16xi32, #tpu.memory_space<smem>>
    %33 = arith.index_cast %32 : i32 to index
    %c0_24 = arith.constant 0 : index
    %c0_25 = arith.constant 0 : index
    %34 = vector.load %arg2[%33, %c0_24, %c0_25] : memref<50x1x16xf32, #tpu.memory_space<vmem>>, vector<1x1x16xf32>
    %35 = vector.shape_cast %34 : vector<1x1x16xf32> to vector<1x16xf32>
    %c24 = arith.constant 24 : index
    %c0_26 = arith.constant 0 : index
    %36 = vector.load %arg6[%c24, %c0_26] : memref<64x16xf32, #tpu.memory_space<vmem>>, vector<1x16xf32>
    tpu.vector_store %arg6[%c24, %c0_26], %35 {strides = array<i32>} : memref<64x16xf32, #tpu.memory_space<vmem>>, vector<1x16xf32>,
    %c11 = arith.constant 11 : index
    %37 = memref.load %arg1[%c11] : memref<16xi32, #tpu.memory_space<smem>>
    %38 = arith.index_cast %37 : i32 to index
    %c0_27 = arith.constant 0 : index
    %c0_28 = arith.constant 0 : index
    %39 = vector.load %arg2[%38, %c0_27, %c0_28] : memref<50x1x16xf32, #tpu.memory_space<vmem>>, vector<1x1x16xf32>
    %40 = vector.shape_cast %39 : vector<1x1x16xf32> to vector<1x16xf32>
    %c25 = arith.constant 25 : index
    %c0_29 = arith.constant 0 : index
    %41 = vector.load %arg6[%c25, %c0_29] : memref<64x16xf32, #tpu.memory_space<vmem>>, vector<1x16xf32>
    tpu.vector_store %arg6[%c25, %c0_29], %40 {strides = array<i32>} : memref<64x16xf32, #tpu.memory_space<vmem>>, vector<1x16xf32>,
    %c4 = arith.constant 4 : index
    %42 = memref.load %arg1[%c4] : memref<16xi32, #tpu.memory_space<smem>>
    %43 = arith.index_cast %42 : i32 to index
    %c0_30 = arith.constant 0 : index
    %c0_31 = arith.constant 0 : index
    %44 = vector.load %arg2[%43, %c0_30, %c0_31] : memref<50x1x16xf32, #tpu.memory_space<vmem>>, vector<1x1x16xf32>
    %45 = vector.shape_cast %44 : vector<1x1x16xf32> to vector<1x16xf32>
    %c32 = arith.constant 32 : index
    %c0_32 = arith.constant 0 : index
    %46 = vector.load %arg6[%c32, %c0_32] : memref<64x16xf32, #tpu.memory_space<vmem>>, vector<1x16xf32>
    tpu.vector_store %arg6[%c32, %c0_32], %45 {strides = array<i32>} : memref<64x16xf32, #tpu.memory_space<vmem>>, vector<1x16xf32>,
    %c12 = arith.constant 12 : index
    %47 = memref.load %arg1[%c12] : memref<16xi32, #tpu.memory_space<smem>>
    %48 = arith.index_cast %47 : i32 to index
    %c0_33 = arith.constant 0 : index
    %c0_34 = arith.constant 0 : index
    %49 = vector.load %arg2[%48, %c0_33, %c0_34] : memref<50x1x16xf32, #tpu.memory_space<vmem>>, vector<1x1x16xf32>
    %50 = vector.shape_cast %49 : vector<1x1x16xf32> to vector<1x16xf32>
    %c33 = arith.constant 33 : index
    %c0_35 = arith.constant 0 : index
    %51 = vector.load %arg6[%c33, %c0_35] : memref<64x16xf32, #tpu.memory_space<vmem>>, vector<1x16xf32>
    tpu.vector_store %arg6[%c33, %c0_35], %50 {strides = array<i32>} : memref<64x16xf32, #tpu.memory_space<vmem>>, vector<1x16xf32>,
    %c5 = arith.constant 5 : index
    %52 = memref.load %arg1[%c5] : memref<16xi32, #tpu.memory_space<smem>>
    %53 = arith.index_cast %52 : i32 to index
    %c0_36 = arith.constant 0 : index
    %c0_37 = arith.constant 0 : index
    %54 = vector.load %arg2[%53, %c0_36, %c0_37] : memref<50x1x16xf32, #tpu.memory_space<vmem>>, vector<1x1x16xf32>
    %55 = vector.shape_cast %54 : vector<1x1x16xf32> to vector<1x16xf32>
    %c40 = arith.constant 40 : index
    %c0_38 = arith.constant 0 : index
    %56 = vector.load %arg6[%c40, %c0_38] : memref<64x16xf32, #tpu.memory_space<vmem>>, vector<1x16xf32>
    tpu.vector_store %arg6[%c40, %c0_38], %55 {strides = array<i32>} : memref<64x16xf32, #tpu.memory_space<vmem>>, vector<1x16xf32>,
    %c13 = arith.constant 13 : index
    %57 = memref.load %arg1[%c13] : memref<16xi32, #tpu.memory_space<smem>>
    %58 = arith.index_cast %57 : i32 to index
    %c0_39 = arith.constant 0 : index
    %c0_40 = arith.constant 0 : index
    %59 = vector.load %arg2[%58, %c0_39, %c0_40] : memref<50x1x16xf32, #tpu.memory_space<vmem>>, vector<1x1x16xf32>
    %60 = vector.shape_cast %59 : vector<1x1x16xf32> to vector<1x16xf32>
    %c41 = arith.constant 41 : index
    %c0_41 = arith.constant 0 : index
    %61 = vector.load %arg6[%c41, %c0_41] : memref<64x16xf32, #tpu.memory_space<vmem>>, vector<1x16xf32>
    tpu.vector_store %arg6[%c41, %c0_41], %60 {strides = array<i32>} : memref<64x16xf32, #tpu.memory_space<vmem>>, vector<1x16xf32>,
    %c6 = arith.constant 6 : index
    %62 = memref.load %arg1[%c6] : memref<16xi32, #tpu.memory_space<smem>>
    %63 = arith.index_cast %62 : i32 to index
    %c0_42 = arith.constant 0 : index
    %c0_43 = arith.constant 0 : index
    %64 = vector.load %arg2[%63, %c0_42, %c0_43] : memref<50x1x16xf32, #tpu.memory_space<vmem>>, vector<1x1x16xf32>
    %65 = vector.shape_cast %64 : vector<1x1x16xf32> to vector<1x16xf32>
    %c48 = arith.constant 48 : index
    %c0_44 = arith.constant 0 : index
    %66 = vector.load %arg6[%c48, %c0_44] : memref<64x16xf32, #tpu.memory_space<vmem>>, vector<1x16xf32>
    tpu.vector_store %arg6[%c48, %c0_44], %65 {strides = array<i32>} : memref<64x16xf32, #tpu.memory_space<vmem>>, vector<1x16xf32>,
    %c14 = arith.constant 14 : index
    %67 = memref.load %arg1[%c14] : memref<16xi32, #tpu.memory_space<smem>>
    %68 = arith.index_cast %67 : i32 to index
    %c0_45 = arith.constant 0 : index
    %c0_46 = arith.constant 0 : index
    %69 = vector.load %arg2[%68, %c0_45, %c0_46] : memref<50x1x16xf32, #tpu.memory_space<vmem>>, vector<1x1x16xf32>
    %70 = vector.shape_cast %69 : vector<1x1x16xf32> to vector<1x16xf32>
    %c49 = arith.constant 49 : index
    %c0_47 = arith.constant 0 : index
    %71 = vector.load %arg6[%c49, %c0_47] : memref<64x16xf32, #tpu.memory_space<vmem>>, vector<1x16xf32>
    tpu.vector_store %arg6[%c49, %c0_47], %70 {strides = array<i32>} : memref<64x16xf32, #tpu.memory_space<vmem>>, vector<1x16xf32>,
    %c7 = arith.constant 7 : index
    %72 = memref.load %arg1[%c7] : memref<16xi32, #tpu.memory_space<smem>>
    %73 = arith.index_cast %72 : i32 to index
    %c0_48 = arith.constant 0 : index
    %c0_49 = arith.constant 0 : index
    %74 = vector.load %arg2[%73, %c0_48, %c0_49] : memref<50x1x16xf32, #tpu.memory_space<vmem>>, vector<1x1x16xf32>
    %75 = vector.shape_cast %74 : vector<1x1x16xf32> to vector<1x16xf32>
    %c56 = arith.constant 56 : index
    %c0_50 = arith.constant 0 : index
    %76 = vector.load %arg6[%c56, %c0_50] : memref<64x16xf32, #tpu.memory_space<vmem>>, vector<1x16xf32>
    tpu.vector_store %arg6[%c56, %c0_50], %75 {strides = array<i32>} : memref<64x16xf32, #tpu.memory_space<vmem>>, vector<1x16xf32>,
    %c15 = arith.constant 15 : index
    %77 = memref.load %arg1[%c15] : memref<16xi32, #tpu.memory_space<smem>>
    %78 = arith.index_cast %77 : i32 to index
    %c0_51 = arith.constant 0 : index
    %c0_52 = arith.constant 0 : index
    %79 = vector.load %arg2[%78, %c0_51, %c0_52] : memref<50x1x16xf32, #tpu.memory_space<vmem>>, vector<1x1x16xf32>
    %80 = vector.shape_cast %79 : vector<1x1x16xf32> to vector<1x16xf32>
    %c57 = arith.constant 57 : index
    %c0_53 = arith.constant 0 : index
    %81 = vector.load %arg6[%c57, %c0_53] : memref<64x16xf32, #tpu.memory_space<vmem>>, vector<1x16xf32>
    tpu.vector_store %arg6[%c57, %c0_53], %80 {strides = array<i32>} : memref<64x16xf32, #tpu.memory_space<vmem>>, vector<1x16xf32>,
    %c0_54 = arith.constant 0 : index
    %c0_55 = arith.constant 0 : index
    %82 = vector.load %arg3[%c0_54, %c0_55] : memref<208x128xbf16, #tpu.memory_space<vmem>>, vector<16x128xbf16>
    %c16_56 = arith.constant 16 : index
    %c0_57 = arith.constant 0 : index
    %83 = vector.load %arg3[%c16_56, %c0_57] : memref<208x128xbf16, #tpu.memory_space<vmem>>, vector<32x128xbf16>
    %c48_58 = arith.constant 48 : index
    %c0_59 = arith.constant 0 : index
    %84 = vector.load %arg3[%c48_58, %c0_59] : memref<208x128xbf16, #tpu.memory_space<vmem>>, vector<32x128xbf16>
    %c80 = arith.constant 80 : index
    %c0_60 = arith.constant 0 : index
    %85 = vector.load %arg3[%c80, %c0_60] : memref<208x128xbf16, #tpu.memory_space<vmem>>, vector<128x128xbf16>
    %c0_61 = arith.constant 0 : index
    %c0_62 = arith.constant 0 : index
    %86 = vector.load %arg4[%c0_61, %c0_62] : memref<8x128xf32, #tpu.memory_space<vmem>>, vector<1x128xf32>
    %c1_63 = arith.constant 1 : index
    %c0_64 = arith.constant 0 : index
    %87 = vector.load %arg4[%c1_63, %c0_64] : memref<8x128xf32, #tpu.memory_space<vmem>>, vector<1x128xf32>
    %c2_65 = arith.constant 2 : index
    %c0_66 = arith.constant 0 : index
    %88 = vector.load %arg4[%c2_65, %c0_66] : memref<8x128xf32, #tpu.memory_space<vmem>>, vector<1x128xf32>
    %c0_67 = arith.constant 0 : index
    %c0_68 = arith.constant 0 : index
    %89 = vector.load %arg6[%c0_67, %c0_68] : memref<64x16xf32, #tpu.memory_space<vmem>>, vector<64x16xf32>
    %90 = arith.truncf %89 : vector<64x16xf32> to vector<64x16xbf16>
    %cst_69 = arith.constant dense<0.000000e+00> : vector<64x128xf32>
    %91 = tpu.matmul %90, %82, %cst_69 {dimension_numbers = #tpu.dot_dimension_numbers<[1], [0], [0], [1], [0, 0, 1, 1], [], []>} : vector<64x16xbf16>, vector<16x128xbf16>, vector<64x128xf32> -> vector<64x128xf32>
    %92 = vector.broadcast %86 : vector<1x128xf32> to vector<64x128xf32>
    %93 = arith.addf %91, %92 : vector<64x128xf32>
    %cst_70 = arith.constant 0.000000e+00 : f32
    %94 = vector.broadcast %cst_70 : f32 to vector<8x32xf32>
    %cst_71 = arith.constant 0.000000e+00 : f32
    %95 = vector.broadcast %cst_71 : f32 to vector<8x32xf32>
    %96 = vector.extract_strided_slice %93 {offsets = [0, 0], sizes = [8, 128], strides = [1, 1]} : vector<64x128xf32> to vector<8x128xf32>
    %97 = arith.truncf %94 : vector<8x32xf32> to vector<8x32xbf16>
    %cst_72 = arith.constant dense<0.000000e+00> : vector<8x128xf32>
    %98 = tpu.matmul %97, %83, %cst_72 {dimension_numbers = #tpu.dot_dimension_numbers<[1], [0], [0], [1], [0, 0, 1, 1], [], []>} : vector<8x32xbf16>, vector<32x128xbf16>, vector<8x128xf32> -> vector<8x128xf32>
    %99 = arith.addf %96, %98 : vector<8x128xf32>
    %100 = arith.negf %99 : vector<8x128xf32>
    %101 = math.exp %100 : vector<8x128xf32>
    %cst_73 = arith.constant 1.000000e+00 : f32
    %102 = vector.broadcast %cst_73 : f32 to vector<8x128xf32>
    %103 = arith.addf %102, %101 : vector<8x128xf32>
    %104 = arith.divf %102, %103 : vector<8x128xf32>
    %105 = math.tanh %99 : vector<8x128xf32>
    %106 = vector.extract_strided_slice %104 {offsets = [0, 0], sizes = [8, 32], strides = [1, 1]} : vector<8x128xf32> to vector<8x32xf32>
    %107 = vector.extract_strided_slice %104 {offsets = [0, 32], sizes = [8, 32], strides = [1, 1]} : vector<8x128xf32> to vector<8x32xf32>
    %108 = vector.extract_strided_slice %105 {offsets = [0, 64], sizes = [8, 32], strides = [1, 1]} : vector<8x128xf32> to vector<8x32xf32>
    %109 = vector.extract_strided_slice %104 {offsets = [0, 96], sizes = [8, 32], strides = [1, 1]} : vector<8x128xf32> to vector<8x32xf32>
    %110 = arith.mulf %107, %95 : vector<8x32xf32>
    %111 = arith.mulf %106, %108 : vector<8x32xf32>
    %112 = arith.addf %110, %111 : vector<8x32xf32>
    %113 = math.tanh %112 : vector<8x32xf32>
    %114 = arith.mulf %109, %113 : vector<8x32xf32>
    %115 = vector.extract_strided_slice %93 {offsets = [8, 0], sizes = [8, 128], strides = [1, 1]} : vector<64x128xf32> to vector<8x128xf32>
    %116 = arith.truncf %114 : vector<8x32xf32> to vector<8x32xbf16>
    %cst_74 = arith.constant dense<0.000000e+00> : vector<8x128xf32>
    %117 = tpu.matmul %116, %83, %cst_74 {dimension_numbers = #tpu.dot_dimension_numbers<[1], [0], [0], [1], [0, 0, 1, 1], [], []>} : vector<8x32xbf16>, vector<32x128xbf16>, vector<8x128xf32> -> vector<8x128xf32>
    %118 = arith.addf %115, %117 : vector<8x128xf32>
    %119 = arith.negf %118 : vector<8x128xf32>
    %120 = math.exp %119 : vector<8x128xf32>
    %cst_75 = arith.constant 1.000000e+00 : f32
    %121 = vector.broadcast %cst_75 : f32 to vector<8x128xf32>
    %122 = arith.addf %121, %120 : vector<8x128xf32>
    %123 = arith.divf %121, %122 : vector<8x128xf32>
    %124 = math.tanh %118 : vector<8x128xf32>
    %125 = vector.extract_strided_slice %123 {offsets = [0, 0], sizes = [8, 32], strides = [1, 1]} : vector<8x128xf32> to vector<8x32xf32>
    %126 = vector.extract_strided_slice %123 {offsets = [0, 32], sizes = [8, 32], strides = [1, 1]} : vector<8x128xf32> to vector<8x32xf32>
    %127 = vector.extract_strided_slice %124 {offsets = [0, 64], sizes = [8, 32], strides = [1, 1]} : vector<8x128xf32> to vector<8x32xf32>
    %128 = vector.extract_strided_slice %123 {offsets = [0, 96], sizes = [8, 32], strides = [1, 1]} : vector<8x128xf32> to vector<8x32xf32>
    %129 = arith.mulf %126, %112 : vector<8x32xf32>
    %130 = arith.mulf %125, %127 : vector<8x32xf32>
    %131 = arith.addf %129, %130 : vector<8x32xf32>
    %132 = math.tanh %131 : vector<8x32xf32>
    %133 = arith.mulf %128, %132 : vector<8x32xf32>
    %134 = vector.extract_strided_slice %93 {offsets = [16, 0], sizes = [8, 128], strides = [1, 1]} : vector<64x128xf32> to vector<8x128xf32>
    %135 = arith.truncf %133 : vector<8x32xf32> to vector<8x32xbf16>
    %cst_76 = arith.constant dense<0.000000e+00> : vector<8x128xf32>
    %136 = tpu.matmul %135, %83, %cst_76 {dimension_numbers = #tpu.dot_dimension_numbers<[1], [0], [0], [1], [0, 0, 1, 1], [], []>} : vector<8x32xbf16>, vector<32x128xbf16>, vector<8x128xf32> -> vector<8x128xf32>
    %137 = arith.addf %134, %136 : vector<8x128xf32>
    %138 = arith.negf %137 : vector<8x128xf32>
    %139 = math.exp %138 : vector<8x128xf32>
    %cst_77 = arith.constant 1.000000e+00 : f32
    %140 = vector.broadcast %cst_77 : f32 to vector<8x128xf32>
    %141 = arith.addf %140, %139 : vector<8x128xf32>
    %142 = arith.divf %140, %141 : vector<8x128xf32>
    %143 = math.tanh %137 : vector<8x128xf32>
    %144 = vector.extract_strided_slice %142 {offsets = [0, 0], sizes = [8, 32], strides = [1, 1]} : vector<8x128xf32> to vector<8x32xf32>
    %145 = vector.extract_strided_slice %142 {offsets = [0, 32], sizes = [8, 32], strides = [1, 1]} : vector<8x128xf32> to vector<8x32xf32>
    %146 = vector.extract_strided_slice %143 {offsets = [0, 64], sizes = [8, 32], strides = [1, 1]} : vector<8x128xf32> to vector<8x32xf32>
    %147 = vector.extract_strided_slice %142 {offsets = [0, 96], sizes = [8, 32], strides = [1, 1]} : vector<8x128xf32> to vector<8x32xf32>
    %148 = arith.mulf %145, %131 : vector<8x32xf32>
    %149 = arith.mulf %144, %146 : vector<8x32xf32>
    %150 = arith.addf %148, %149 : vector<8x32xf32>
    %151 = math.tanh %150 : vector<8x32xf32>
    %152 = arith.mulf %147, %151 : vector<8x32xf32>
    %153 = vector.extract_strided_slice %93 {offsets = [24, 0], sizes = [8, 128], strides = [1, 1]} : vector<64x128xf32> to vector<8x128xf32>
    %154 = arith.truncf %152 : vector<8x32xf32> to vector<8x32xbf16>
    %cst_78 = arith.constant dense<0.000000e+00> : vector<8x128xf32>
    %155 = tpu.matmul %154, %83, %cst_78 {dimension_numbers = #tpu.dot_dimension_numbers<[1], [0], [0], [1], [0, 0, 1, 1], [], []>} : vector<8x32xbf16>, vector<32x128xbf16>, vector<8x128xf32> -> vector<8x128xf32>
    %156 = arith.addf %153, %155 : vector<8x128xf32>
    %157 = arith.negf %156 : vector<8x128xf32>
    %158 = math.exp %157 : vector<8x128xf32>
    %cst_79 = arith.constant 1.000000e+00 : f32
    %159 = vector.broadcast %cst_79 : f32 to vector<8x128xf32>
    %160 = arith.addf %159, %158 : vector<8x128xf32>
    %161 = arith.divf %159, %160 : vector<8x128xf32>
    %162 = math.tanh %156 : vector<8x128xf32>
    %163 = vector.extract_strided_slice %161 {offsets = [0, 0], sizes = [8, 32], strides = [1, 1]} : vector<8x128xf32> to vector<8x32xf32>
    %164 = vector.extract_strided_slice %161 {offsets = [0, 32], sizes = [8, 32], strides = [1, 1]} : vector<8x128xf32> to vector<8x32xf32>
    %165 = vector.extract_strided_slice %162 {offsets = [0, 64], sizes = [8, 32], strides = [1, 1]} : vector<8x128xf32> to vector<8x32xf32>
    %166 = vector.extract_strided_slice %161 {offsets = [0, 96], sizes = [8, 32], strides = [1, 1]} : vector<8x128xf32> to vector<8x32xf32>
    %167 = arith.mulf %164, %150 : vector<8x32xf32>
    %168 = arith.mulf %163, %165 : vector<8x32xf32>
    %169 = arith.addf %167, %168 : vector<8x32xf32>
    %170 = math.tanh %169 : vector<8x32xf32>
    %171 = arith.mulf %166, %170 : vector<8x32xf32>
    %172 = vector.extract_strided_slice %93 {offsets = [32, 0], sizes = [8, 128], strides = [1, 1]} : vector<64x128xf32> to vector<8x128xf32>
    %173 = arith.truncf %171 : vector<8x32xf32> to vector<8x32xbf16>
    %cst_80 = arith.constant dense<0.000000e+00> : vector<8x128xf32>
    %174 = tpu.matmul %173, %83, %cst_80 {dimension_numbers = #tpu.dot_dimension_numbers<[1], [0], [0], [1], [0, 0, 1, 1], [], []>} : vector<8x32xbf16>, vector<32x128xbf16>, vector<8x128xf32> -> vector<8x128xf32>
    %175 = arith.addf %172, %174 : vector<8x128xf32>
    %176 = arith.negf %175 : vector<8x128xf32>
    %177 = math.exp %176 : vector<8x128xf32>
    %cst_81 = arith.constant 1.000000e+00 : f32
    %178 = vector.broadcast %cst_81 : f32 to vector<8x128xf32>
    %179 = arith.addf %178, %177 : vector<8x128xf32>
    %180 = arith.divf %178, %179 : vector<8x128xf32>
    %181 = math.tanh %175 : vector<8x128xf32>
    %182 = vector.extract_strided_slice %180 {offsets = [0, 0], sizes = [8, 32], strides = [1, 1]} : vector<8x128xf32> to vector<8x32xf32>
    %183 = vector.extract_strided_slice %180 {offsets = [0, 32], sizes = [8, 32], strides = [1, 1]} : vector<8x128xf32> to vector<8x32xf32>
    %184 = vector.extract_strided_slice %181 {offsets = [0, 64], sizes = [8, 32], strides = [1, 1]} : vector<8x128xf32> to vector<8x32xf32>
    %185 = vector.extract_strided_slice %180 {offsets = [0, 96], sizes = [8, 32], strides = [1, 1]} : vector<8x128xf32> to vector<8x32xf32>
    %186 = arith.mulf %183, %169 : vector<8x32xf32>
    %187 = arith.mulf %182, %184 : vector<8x32xf32>
    %188 = arith.addf %186, %187 : vector<8x32xf32>
    %189 = math.tanh %188 : vector<8x32xf32>
    %190 = arith.mulf %185, %189 : vector<8x32xf32>
    %191 = vector.extract_strided_slice %93 {offsets = [40, 0], sizes = [8, 128], strides = [1, 1]} : vector<64x128xf32> to vector<8x128xf32>
    %192 = arith.truncf %190 : vector<8x32xf32> to vector<8x32xbf16>
    %cst_82 = arith.constant dense<0.000000e+00> : vector<8x128xf32>
    %193 = tpu.matmul %192, %83, %cst_82 {dimension_numbers = #tpu.dot_dimension_numbers<[1], [0], [0], [1], [0, 0, 1, 1], [], []>} : vector<8x32xbf16>, vector<32x128xbf16>, vector<8x128xf32> -> vector<8x128xf32>
    %194 = arith.addf %191, %193 : vector<8x128xf32>
    %195 = arith.negf %194 : vector<8x128xf32>
    %196 = math.exp %195 : vector<8x128xf32>
    %cst_83 = arith.constant 1.000000e+00 : f32
    %197 = vector.broadcast %cst_83 : f32 to vector<8x128xf32>
    %198 = arith.addf %197, %196 : vector<8x128xf32>
    %199 = arith.divf %197, %198 : vector<8x128xf32>
    %200 = math.tanh %194 : vector<8x128xf32>
    %201 = vector.extract_strided_slice %199 {offsets = [0, 0], sizes = [8, 32], strides = [1, 1]} : vector<8x128xf32> to vector<8x32xf32>
    %202 = vector.extract_strided_slice %199 {offsets = [0, 32], sizes = [8, 32], strides = [1, 1]} : vector<8x128xf32> to vector<8x32xf32>
    %203 = vector.extract_strided_slice %200 {offsets = [0, 64], sizes = [8, 32], strides = [1, 1]} : vector<8x128xf32> to vector<8x32xf32>
    %204 = vector.extract_strided_slice %199 {offsets = [0, 96], sizes = [8, 32], strides = [1, 1]} : vector<8x128xf32> to vector<8x32xf32>
    %205 = arith.mulf %202, %188 : vector<8x32xf32>
    %206 = arith.mulf %201, %203 : vector<8x32xf32>
    %207 = arith.addf %205, %206 : vector<8x32xf32>
    %208 = math.tanh %207 : vector<8x32xf32>
    %209 = arith.mulf %204, %208 : vector<8x32xf32>
    %210 = vector.extract_strided_slice %93 {offsets = [48, 0], sizes = [8, 128], strides = [1, 1]} : vector<64x128xf32> to vector<8x128xf32>
    %211 = arith.truncf %209 : vector<8x32xf32> to vector<8x32xbf16>
    %cst_84 = arith.constant dense<0.000000e+00> : vector<8x128xf32>
    %212 = tpu.matmul %211, %83, %cst_84 {dimension_numbers = #tpu.dot_dimension_numbers<[1], [0], [0], [1], [0, 0, 1, 1], [], []>} : vector<8x32xbf16>, vector<32x128xbf16>, vector<8x128xf32> -> vector<8x128xf32>
    %213 = arith.addf %210, %212 : vector<8x128xf32>
    %214 = arith.negf %213 : vector<8x128xf32>
    %215 = math.exp %214 : vector<8x128xf32>
    %cst_85 = arith.constant 1.000000e+00 : f32
    %216 = vector.broadcast %cst_85 : f32 to vector<8x128xf32>
    %217 = arith.addf %216, %215 : vector<8x128xf32>
    %218 = arith.divf %216, %217 : vector<8x128xf32>
    %219 = math.tanh %213 : vector<8x128xf32>
    %220 = vector.extract_strided_slice %218 {offsets = [0, 0], sizes = [8, 32], strides = [1, 1]} : vector<8x128xf32> to vector<8x32xf32>
    %221 = vector.extract_strided_slice %218 {offsets = [0, 32], sizes = [8, 32], strides = [1, 1]} : vector<8x128xf32> to vector<8x32xf32>
    %222 = vector.extract_strided_slice %219 {offsets = [0, 64], sizes = [8, 32], strides = [1, 1]} : vector<8x128xf32> to vector<8x32xf32>
    %223 = vector.extract_strided_slice %218 {offsets = [0, 96], sizes = [8, 32], strides = [1, 1]} : vector<8x128xf32> to vector<8x32xf32>
    %224 = arith.mulf %221, %207 : vector<8x32xf32>
    %225 = arith.mulf %220, %222 : vector<8x32xf32>
    %226 = arith.addf %224, %225 : vector<8x32xf32>
    %227 = math.tanh %226 : vector<8x32xf32>
    %228 = arith.mulf %223, %227 : vector<8x32xf32>
    %229 = vector.extract_strided_slice %93 {offsets = [56, 0], sizes = [8, 128], strides = [1, 1]} : vector<64x128xf32> to vector<8x128xf32>
    %230 = arith.truncf %228 : vector<8x32xf32> to vector<8x32xbf16>
    %cst_86 = arith.constant dense<0.000000e+00> : vector<8x128xf32>
    %231 = tpu.matmul %230, %83, %cst_86 {dimension_numbers = #tpu.dot_dimension_numbers<[1], [0], [0], [1], [0, 0, 1, 1], [], []>} : vector<8x32xbf16>, vector<32x128xbf16>, vector<8x128xf32> -> vector<8x128xf32>
    %232 = arith.addf %229, %231 : vector<8x128xf32>
    %233 = arith.negf %232 : vector<8x128xf32>
    %234 = math.exp %233 : vector<8x128xf32>
    %cst_87 = arith.constant 1.000000e+00 : f32
    %235 = vector.broadcast %cst_87 : f32 to vector<8x128xf32>
    %236 = arith.addf %235, %234 : vector<8x128xf32>
    %237 = arith.divf %235, %236 : vector<8x128xf32>
    %238 = math.tanh %232 : vector<8x128xf32>
    %239 = vector.extract_strided_slice %237 {offsets = [0, 0], sizes = [8, 32], strides = [1, 1]} : vector<8x128xf32> to vector<8x32xf32>
    %240 = vector.extract_strided_slice %237 {offsets = [0, 32], sizes = [8, 32], strides = [1, 1]} : vector<8x128xf32> to vector<8x32xf32>
    %241 = vector.extract_strided_slice %238 {offsets = [0, 64], sizes = [8, 32], strides = [1, 1]} : vector<8x128xf32> to vector<8x32xf32>
    %242 = vector.extract_strided_slice %237 {offsets = [0, 96], sizes = [8, 32], strides = [1, 1]} : vector<8x128xf32> to vector<8x32xf32>
    %243 = arith.mulf %240, %226 : vector<8x32xf32>
    %244 = arith.mulf %239, %241 : vector<8x32xf32>
    %245 = arith.addf %243, %244 : vector<8x32xf32>
    %246 = math.tanh %245 : vector<8x32xf32>
    %247 = arith.mulf %242, %246 : vector<8x32xf32>
    %248 = arith.truncf %247 : vector<8x32xf32> to vector<8x32xbf16>
    %cst_88 = arith.constant dense<0.000000e+00> : vector<8x128xf32>
    %249 = tpu.matmul %248, %84, %cst_88 {dimension_numbers = #tpu.dot_dimension_numbers<[1], [0], [0], [1], [0, 0, 1, 1], [], []>} : vector<8x32xbf16>, vector<32x128xbf16>, vector<8x128xf32> -> vector<8x128xf32>
    %250 = vector.broadcast %87 : vector<1x128xf32> to vector<8x128xf32>
    %251 = arith.addf %249, %250 : vector<8x128xf32>
    %cst_89 = arith.constant 0.000000e+00 : f32
    %252 = vector.broadcast %cst_89 : f32 to vector<8x128xf32>
    %253 = arith.maximumf %251, %252 : vector<8x128xf32>
    %254 = arith.truncf %253 : vector<8x128xf32> to vector<8x128xbf16>
    %cst_90 = arith.constant dense<0.000000e+00> : vector<8x128xf32>
    %255 = tpu.matmul %254, %85, %cst_90 {dimension_numbers = #tpu.dot_dimension_numbers<[1], [0], [0], [1], [0, 0, 1, 1], [], []>} : vector<8x128xbf16>, vector<128x128xbf16>, vector<8x128xf32> -> vector<8x128xf32>
    %256 = vector.broadcast %88 : vector<1x128xf32> to vector<8x128xf32>
    %257 = arith.addf %255, %256 : vector<8x128xf32>
    %c0_91 = arith.constant 0 : index
    %c0_92 = arith.constant 0 : index
    %258 = vector.load %arg5[%c0_91, %c0_92] : memref<8x128xf32, #tpu.memory_space<vmem>>, vector<8x128xf32>
    tpu.vector_store %arg5[%c0_91, %c0_92], %257 {strides = array<i32>} : memref<8x128xf32, #tpu.memory_space<vmem>>, vector<8x128xf32>,
    return
  }
  func.func @transform_0(%arg0: i32, %arg1: memref<16xi32, #tpu.memory_space<smem>>) -> (i32, i32, i32) {
    %c0_i32 = arith.constant 0 : i32
    %c0_i32_0 = arith.constant 0 : i32
    %c0_i32_1 = arith.constant 0 : i32
    %c0_i32_2 = arith.constant 0 : i32
    return %c0_i32, %c0_i32_0, %c0_i32_1 : i32, i32, i32
  }
  func.func @transform_1(%arg0: i32, %arg1: memref<16xi32, #tpu.memory_space<smem>>) -> (i32, i32) {
    %c0_i32 = arith.constant 0 : i32
    %c0_i32_0 = arith.constant 0 : i32
    %c0_i32_1 = arith.constant 0 : i32
    return %c0_i32, %c0_i32_0 : i32, i32
  }
  func.func @transform_2(%arg0: i32, %arg1: memref<16xi32, #tpu.memory_space<smem>>) -> (i32, i32) {
    %c0_i32 = arith.constant 0 : i32
    %c0_i32_0 = arith.constant 0 : i32
    %c0_i32_1 = arith.constant 0 : i32
    return %c0_i32, %c0_i32_0 : i32, i32
  }
  func.func @transform_3(%arg0: i32, %arg1: memref<16xi32, #tpu.memory_space<smem>>) -> (i32, i32) {
    %c0_i32 = arith.constant 0 : i32
    %c0_i32_0 = arith.constant 0 : i32
    %c0_i32_1 = arith.constant 0 : i32
    return %c0_i32, %c0_i32_0 : i32, i32
  }
}

</mosaic_0001>

<bundles_post_ra>
// kernel: tpu_custom_call.1
= control target key start
LH: loop header
LB: loop body
LE: loop exit
PB: predicated region body
PF: predicated region fallthrough
CT: control target
= control target key end

     0   :  { %s1653_s0 = inlined_call_operand.vmem [shape: s32[16], index: 0, kind: input, shape index: {}]   ;;  %s1654_s1 = inlined_call_operand.vmem [shape: f32[50,1,16], index: 1, kind: input, shape index: {}]   ;;  %s1655_s2 = inlined_call_operand.hbm [shape: bf16[208,128], index: 2, kind: input, shape index: {}]   ;;  %s1656_s3 = inlined_call_operand.vmem [shape: f32[8,128], index: 3, kind: input, shape index: {}]   ;;  %s1657_s4 = inlined_call_operand.hbm [shape: f32[8,128], index: 4, kind: output, shape index: {}]  }
   0x1   :  { %s9_s17 = sshll.u32 %s1653_s0, 4  ;;  %s10_s17 = int_to_ptr.vmem [resolvable:$true] %s9_s17 }
   0x2   :  { %s1293_s18 = scalar_lea.vmem %s10_s17, 16  ;;  %p1298_p1 = scmp.lt.s32.totalorder %s10_s17, %s10_s17 }
   0x3   :  { %p1294_p0 = scmp.ne.s32.totalorder %s10_s17, %s1293_s18  ;;  %p1299_p2 = scmp.lt.s32.totalorder %s1293_s18, %s1293_s18 }
   0x5   :  { %p1300_p3 = por %p1299_p2, %p1298_p1 }
   0x7   :  { %p1301_p4 = pnand %p1300_p3, %p1294_p0 }
   0x9   :  { %1304 = shalt.err (!%p1301_p4)  }
   0xa   :  { %s1355_s19 = smov [#allocation4]  }
   0xb   :  { %12 = dma.vmem_to_smem %s10_s17, 16, %s1355_s19, [#allocation3] }
   0xc   :  { %1349 = dma.done.wait [#allocation3], 16 }
   0xd   :  { %1350 = vsyncadd [#allocation3], 4294967280 }
   0xe   :  { %14 = sfence }
   0xf   :  { %15 = vsyncpa [#allocation6], 0 }
  0x10   :  { %16 = vsyncpa [#allocation7], 0  ;;  %s1356_s20 = smov [#allocation5]   ;;  %s1305_s23 = scalar_lea.hbm %s1655_s2, 1664 }
  0x11   :  { %s24_s21 = sshll.u32 %s1356_s20, 4  ;;  %p1306_p5 = scmp.ne.s32.totalorder %s1655_s2, %s1305_s23  ;;  %s25_s21 = int_to_ptr.vmem [resolvable:$true] %s24_s21 }
  0x12   :  { %p1309_p6 = scmp.lt.u32.totalorder %s1305_s23, %s1655_s2 }
  0x14   :  { %p1311_p7 = pnand %p1309_p6, %p1306_p5 }
  0x16   :  { %1314 = shalt.err (!%p1311_p7)
}
  0x17   :  { %s1315_s28 = scalar_lea.vmem %s25_s21, 1664  ;;  %p1320_p9 = scmp.lt.s32.totalorder %s25_s21, %s25_s21 }
  0x18   :  { %p1316_p8 = scmp.ne.s32.totalorder %s25_s21, %s1315_s28  ;;  %p1321_p10 = scmp.lt.s32.totalorder %s1315_s28, %s1315_s28 }
  0x1a   :  { %p1322_p11 = por %p1321_p10, %p1320_p9 }
  0x1c   :  { %p1323_p12 = pnand %p1322_p11, %p1316_p8 }
  0x1e   :  { %1326 = shalt.err (!%p1323_p12)
}
  0x1f   :  { %s1357_s29 = smov 64   ;;  %s1358_s30 = smov 4  }
  0x20   :  { %30 = dma.hbm_to_vmem [thread:$0]  %s1655_s2, 1664, %s25_s21, [#allocation6], %s1357_s29, %s1357_s29, %s1358_s30  }
  0x21   :  { %1351 = dma.done.wait [#allocation6], 1664  }
  0x22   :  { %1352 = vsyncadd [#allocation6], 4294965632  ;;  %vm37_vm0 = vcmask 130048   ;;  %v1359_v0 = vmov 0.0   ;;  %s46_s7 = sld [smem:[#allocation4]]  ;;  %vm1360_vm1 = vmmov 0  }
  0x23   :  { %38 = vst.msk [vmem:[#allocation2] sm:$0xff] %vm37_vm0, %v1359_v0  ;;  %39 = vst.msk [vmem:[#allocation2 + $0x8] sm:$0xff] %vm37_vm0, %v1359_v0  ;;  %s1013_s8 = sld [smem:[#allocation4 + $0x8]]  ;;  %1139 = vmatprep.subr.bf16.mxu1 %v1359_v0  ;;  %1143 = vmatprep.mubr.msk.bf16.mxu1 %vm1360_vm1, %v1359_v0  ;;  %s1014_s2 = sld [smem:[#allocation4 + $0x1]]  ;;  %vm49_vm2 = vcmask 122880   ;;  %v1216_v1 = vld [vmem:[#allocation5] sm:$0xff]  }
  0x24   :  { %40 = vst.msk [vmem:[#allocation2 + $0x10] sm:$0xff] %vm37_vm0, %v1359_v0  ;;  %41 = vst.msk [vmem:[#allocation2 + $0x18] sm:$0xff] %vm37_vm0, %v1359_v0  ;;  %s1015_s9 = sld [smem:[#allocation4 + $0x9]]  ;;  %s1016_s10 = sld [smem:[#allocation4 + $0x2]]  ;;  %1105 = vmatprep.subr.bf16.mxu0 %v1216_v1  ;;  %v1467_v8 = vld [vmem:[#allocation5 + $0x8] sm:$0xff]   ;;  %v1496_v15 = vld [vmem:[#allocation5 + $0x10] sm:$0xff]  }
  0x25   :  { %42 = vst.msk [vmem:[#allocation2 + $0x20] sm:$0xff] %vm37_vm0, %v1359_v0  ;;  %43 = vst.msk [vmem:[#allocation2 + $0x28] sm:$0xff] %vm37_vm0, %v1359_v0  ;;  %s1017_s11 = sld [smem:[#allocation4 + $0xa]]  ;;  %s1425_s12 = sld [smem:[#allocation4 + $0x3]]  ;;  %1106 = vmatpush3.bf16.msra.mxu0 %v1216_v1  ;;  %1140 = vmatpush3.bf16.msra.mxu1 %v1467_v8  ;;  %v1361_v32 = vmov 0   ;;  %vm251_vm3 = vcmask 261120  }
  0x26   :  { %44 = vst.msk [vmem:[#allocation2 + $0x30] sm:$0xff] %vm37_vm0, %v1359_v0  ;;  %45 = vst.msk [vmem:[#allocation2 + $0x38] sm:$0xff] %vm37_vm0, %v1359_v0  ;;  %s1427_s13 = sld [smem:[#allocation4 + $0xb]]  ;;  %s1429_s14 = sld [smem:[#allocation4 + $0x4]]  ;;  %1115 = vmatprep.subr.bf16.mxu0 %v1359_v0  ;;  %1141 = vmatprep.subr.bf16.mxu1 %v1359_v0  ;;  %v1028_v33 = vld [vmem:[%s1656_s3] ss:$0 sm:$0xff] }
  0x27   :  { %s1431_s15 = sld [smem:[#allocation4 + $0xc]]  ;;  %s1433_s16 = sld [smem:[#allocation4 + $0x5]] }
  0x28   :  { %s1435_s17 = sld [smem:[#allocation4 + $0xd]]  ;;  %s47_s20 = scalar_lea.vmem %s1654_s1, %s46_s7 }
  0x29   :  { %s52_s0 = scalar_lea.vmem %s1654_s1, %s1013_s8  ;;  %v48_v2 = vld [vmem:[%s47_s20] sm:$0x1]  ;;  %s56_s25 = scalar_lea.vmem %s1654_s1, %s1014_s2  ;;  %1142 = vmatpush3.bf16.msra.mxu1 %v1496_v15 }
  0x2a   :  { %v53_v3 = vld [vmem:[%s52_s0] sm:$0x1]  ;;  %s60_s28 = scalar_lea.vmem %s1654_s1, %s1015_s9  ;;  %50 = vst.msk [vmem:[#allocation2] sm:$0x1] %vm49_vm2, %v48_v2  ;;  %s64_s6 = scalar_lea.vmem %s1654_s1, %s1016_s10  ;;  %1155 = vmatprep.subr.bf16.mxu1 %v1359_v0 }
  0x2b   :  { %54 = vst.msk [vmem:[#allocation2 + $0x1] sm:$0x1] %vm49_vm2, %v53_v3  ;;  %v57_v4 = vld [vmem:[%s56_s25] sm:$0x1]  ;;  %s68_s2 = scalar_lea.vmem %s1654_s1, %s1017_s11  ;;  %s72_s19 = scalar_lea.vmem %s1654_s1, %s1425_s12 }
  0x2c   :  { %v61_v5 = vld [vmem:[%s60_s28] sm:$0x1]  ;;  %58 = vst.msk [vmem:[#allocation2 + $0x8] sm:$0x1] %vm49_vm2, %v57_v4  ;;  %s76_s21 = scalar_lea.vmem %s1654_s1, %s1427_s13  ;;  %s80_s0 = scalar_lea.vmem %s1654_s1, %s1429_s14 }
  0x2d   :  { %62 = vst.msk [vmem:[#allocation2 + $0x9] sm:$0x1] %vm49_vm2, %v61_v5  ;;  %v65_v6 = vld [vmem:[%s64_s6] sm:$0x1]  ;;  %s84_s24 = scalar_lea.vmem %s1654_s1, %s1431_s15  ;;  %s88_s26 = scalar_lea.vmem %s1654_s1, %s1433_s16 }
  0x2e   :  { %v69_v7 = vld [vmem:[%s68_s2] sm:$0x1]  ;;  %66 = vst.msk [vmem:[#allocation2 + $0x10] sm:$0x1] %vm49_vm2, %v65_v6  ;;  %s92_s30 = scalar_lea.vmem %s1654_s1, %s1435_s17  ;;  %s1024_s14 = sld [smem:[#allocation4 + $0x6]] }
  0x2f   :  { %70 = vst.msk [vmem:[#allocation2 + $0x11] sm:$0x1] %vm49_vm2, %v69_v7  ;;  %v73_v9 = vld [vmem:[%s72_s19] sm:$0x1]  ;;  %s1025_s15 = sld [smem:[#allocation4 + $0xe]]  ;;  %s1026_s16 = sld [smem:[#allocation4 + $0x7]] }
  0x30   :  { %v77_v10 = vld [vmem:[%s76_s21] sm:$0x1]  ;;  %74 = vst.msk [vmem:[#allocation2 + $0x18] sm:$0x1] %vm49_vm2, %v73_v9  ;;  %s1027_s17 = sld [smem:[#allocation4 + $0xf]]  ;;  %s1363_s13 = smov [#allocation8]  }
  0x31   :  { %78 = vst.msk [vmem:[#allocation2 + $0x19] sm:$0x1] %vm49_vm2, %v77_v10  ;;  %v81_v11 = vld [vmem:[%s80_s0] sm:$0x1]  ;;  %s1362_s0 = smov 32   ;;  %s988_s25 = sshll.u32 %s1363_s13, 4  ;;  %s989_s25 = int_to_ptr.vmem [resolvable:$true] %s988_s25 }
  0x32   :  { %v85_v12 = vld [vmem:[%s84_s24] sm:$0x1]  ;;  %82 = vst.msk [vmem:[#allocation2 + $0x20] sm:$0x1] %vm49_vm2, %v81_v11  ;;  %p1332_p0 = scmp.lt.s32.totalorder %s989_s25, %s989_s25 }
  0x33   :  { %86 = vst.msk [vmem:[#allocation2 + $0x21] sm:$0x1] %vm49_vm2, %v85_v12  ;;  %v89_v13 = vld [vmem:[%s88_s26] sm:$0x1]  ;;  %s1327_s26 = scalar_lea.vmem %s989_s25, 128 }
  0x34   :  { %v93_v14 = vld [vmem:[%s92_s30] sm:$0x1]  ;;  %90 = vst.msk [vmem:[#allocation2 + $0x28] sm:$0x1] %vm49_vm2, %v89_v13  ;;  %v141_v17 = vld [vmem:[#allocation2 + $0x8] sm:$0xff]  ;;  %s96_s7 = scalar_lea.vmem %s1654_s1, %s1024_s14  ;;  %p1328_p13 = scmp.ne.s32.totalorder %s989_s25, %s1327_s26 }
  0x35   :  { %94 = vst.msk [vmem:[#allocation2 + $0x29] sm:$0x1] %vm49_vm2, %v93_v14  ;;  %v140_v16 = vld [vmem:[#allocation2] sm:$0xff]  ;;  %s100_s9 = scalar_lea.vmem %s1654_s1, %s1025_s15  ;;  %s104_s20 = scalar_lea.vmem %s1654_s1, %s1026_s16 }
  0x36   :  { %v148_v18 = vpack.c.bf16 %v141_v17, %v140_v16  ;;  %v142_v19 = vld [vmem:[#allocation2 + $0x10] sm:$0xff]  ;;  %v97_v23 = vld [vmem:[%s96_s7] sm:$0x1]  ;;  %s108_s11 = scalar_lea.vmem %s1654_s1, %s1027_s17  ;;  %p1333_p1 = scmp.lt.s32.totalorder %s1327_s26, %s1327_s26 }
  0x37   :  { %98 = vst.msk [vmem:[#allocation2 + $0x30] sm:$0x1] %vm49_vm2, %v97_v23  ;;  %v101_v25 = vld [vmem:[%s100_s9] sm:$0x1] }
  0x38   :  { %v143_v20 = vld [vmem:[#allocation2 + $0x18] sm:$0xff]  ;;  %1107 = vmatprep.mubr.msk.bf16.mxu0 %vm37_vm0, %v148_v18  ;;  %v105_v26 = vld [vmem:[%s104_s20] sm:$0x1]  ;;  %102 = vst.msk [vmem:[#allocation2 + $0x31] sm:$0x1] %vm49_vm2, %v101_v25  ;;  %p1334_p2 = por %p1333_p1, %p1332_p0 }
  0x39   :  { %v149_v21 = vpack.c.bf16 %v143_v20, %v142_v19  ;;  %106 = vst.msk [vmem:[#allocation2 + $0x38] sm:$0x1] %vm49_vm2, %v105_v26  ;;  %v109_v28 = vld [vmem:[%s108_s11] sm:$0x1] }
  0x3a   :  { %v144_v22 = vld [vmem:[#allocation2 + $0x20] sm:$0xff]  ;;  %110 = vst.msk [vmem:[#allocation2 + $0x39] sm:$0x1] %vm49_vm2, %v109_v28  ;;  %p1335_p3 = pnand %p1334_p2, %p1328_p13 }
  0x3b   :  { %1108 = vmatmul.mubr.msk.bf16.vlgmr.msra.gmra.mrb[0].mxu0 %vm37_vm0, %v149_v21 }
  0x3c   :  { %v145_v24 = vld [vmem:[#allocation2 + $0x28] sm:$0xff]  ;;  %1116 = vmatpush3.bf16.msra.mxu0 %v1467_v8 }
  0x3d   :  { %v150_v27 = vpack.c.bf16 %v145_v24, %v144_v22  ;;  %1117 = vmatprep.subr.bf16.mxu0 %v1359_v0 }
  0x3f   :  { %1111 = vmatprep.mubr.msk.bf16.mxu0 %vm37_vm0, %v150_v27  ;;  %v146_v29 = vld [vmem:[#allocation2 + $0x30] sm:$0xff] }
  0x40   :  { %1118 = vmatpush3.bf16.msra.mxu0 %v1496_v15 }
  0x41   :  { %1123 = vmatprep.subr.bf16.mxu0 %v1359_v0  ;;  %v147_v30 = vld [vmem:[#allocation2 + $0x38] sm:$0xff] }
  0x42   :  { %v151_v31 = vpack.c.bf16 %v147_v30, %v146_v29 }
  0x44   :  { %1112 = vmatmul.mubr.msk.bf16.gmra.mrb[4].mxu0 %vm37_vm0, %v151_v31 }
  0x45   :  { %1119 = vmatprep.mubr.msk.bf16.mxu0 %vm1360_vm1, %v1359_v0 }
  0x4c   :  { %1120 = vmatmul.mubr.bf16.vlgmr.msra.gmra.mrb[8].mxu0 %v1361_v32 }
  0x4d   :  { %1124 = vmatpush3.bf16.msra.mxu0 %v1467_v8  ;;  %1127 = vmatprep.mubr.msk.bf16.mxu0 %vm1360_vm1, %v1359_v0 }
  0x4e   :  { %1125 = vmatprep.subr.bf16.mxu0 %v1359_v0 }
  0x51   :  { %1126 = vmatpush3.bf16.msra.mxu0 %v1496_v15 }
  0x52   :  { %1131 = vmatprep.subr.bf16.mxu0 %v1359_v0 }
 0x10e   :  { %v1109_v34 = vpop.f32.mrb[0].mxu0 }
 0x10f   :  { %v1535_v35 = vadd.f32 %v1109_v34, %v1028_v33  ;;  %v208_v36 = vpop.f32.mrb[1].mxu0 }
 0x110   :  { %v1110_v37 = vpop.f32.mrb[2].mxu0  ;;  %v209_v49 = vadd.f32 %v1028_v33, %v208_v36 }
 0x111   :  { %v1537_v38 = vadd.f32 %v1110_v37, %v1028_v33  ;;  %v211_v39 = vpop.f32.mrb[3].mxu0 }
 0x112   :  { %v212_v40 = vadd.f32 %v1028_v33, %v211_v39 }
 0x117   :  { %v1113_v41 = vpop.f32.mrb[4].mxu0 }
 0x118   :  { %v1539_v42 = vadd.f32 %v1113_v41, %v1028_v33  ;;  %v224_v43 = vpop.f32.mrb[5].mxu0 }
 0x119   :  { %v1541_v44 = vadd.f32 %v1028_v33, %v224_v43  ;;  %v1114_v45 = vpop.f32.mrb[6].mxu0 }
 0x11a   :  { %v1543_v46 = vadd.f32 %v1114_v45, %v1028_v33  ;;  %v227_v47 = vpop.f32.mrb[7].mxu0 }
 0x11b   :  { %v1545_v48 = vadd.f32 %v1028_v33, %v227_v47 }
 0x11f   :  { %v289_v50 = vpop.f32.mrb[8].mxu0 }
 0x120   :  { %v295_v51 = vadd.f32 %v289_v50, %v209_v49  ;;  %v1121_v52 = vpop.f32.mrb[9].mxu0 }
 0x121   :  { %v292_v53 = vpop.f32.mrb[10].mxu0 }
 0x122   :  { %v1122_v54 = vpop.f32.mrb[11].mxu0  ;;  %1229 = vtanh.f32 %v295_v51  ;;  %v1036_v56 = vmul.f32 -1.442695, %v295_v51 }
 0x124   :  { %1231 = vpow2.f32 %v1036_v56 }
 0x12c   :  { %v1230_v55 = vpop.eup %1229 }
 0x12d   :  { %305 = vrot.lane.b32.xlu0 %v1230_v55, %s1357_s29 }
 0x12e   :  { %v1232_v57 = vpop.eup %1231 }
 0x12f   :  { %v299_v58 = vadd.f32 1.0, %v1232_v57 }
 0x131   :  { %1233 = vrcp.f32 %v299_v58 }
 0x13b   :  { %v1234_v59 = vpop.eup %1233 }
 0x13c   :  { %v303_v62 = vmul.f32 0.0, %v1234_v59 }
 0x19f   :  { %v306_v60 = vpop.permute.xlu0 %305 }
 0x1a0   :  { %v308_v61 = vmul.f32 %v1234_v59, %v306_v60 }
 0x1a2   :  { %310 = vrot.lane.b32.xlu0 %v308_v61, %s1362_s0 }
 0x214   :  { %v311_v63 = vpop.permute.xlu0 %310 }
 0x215   :  { %v313_v1 = vadd.f32 %v311_v63, %v303_v62 }
 0x217   :  { %1235 = vtanh.f32 %v313_v1 }
 0x221   :  { %v1236_v2 = vpop.eup %1235 }
 0x222   :  { %316 = vrot.lane.b32.xlu1 %v1236_v2, %s1357_s29 }
 0x294   :  { %v317_v3 = vpop.permute.xlu1 %316 }
 0x295   :  { %v319_v4 = vmul.f32 %v1234_v59, %v317_v3 }
 0x297   :  { %v320_v5 = vpack.c.bf16 %v319_v4, %v319_v4 }
 0x299   :  { %322 = vrot.lane.b32.xlu1 %v320_v5, %s1362_s0 }
 0x30b   :  { %v323_v6 = vpop.permute.xlu1 %322 }
 0x30c   :  { %1128 = vmatmul.mubr.msk.bf16.vlgmr.msra.gmra.mrb[12].mxu0 %vm251_vm3, %v323_v6 }
 0x30d   :  { %1132 = vmatpush3.bf16.msra.mxu0 %v1467_v8  ;;  %1135 = vmatprep.mubr.msk.bf16.mxu0 %vm1360_vm1, %v1359_v0 }
 0x30e   :  { %1133 = vmatprep.subr.bf16.mxu0 %v1359_v0 }
 0x311   :  { %1134 = vmatpush3.bf16.msra.mxu0 %v1496_v15 }
 0x312   :  { %1147 = vmatprep.subr.bf16.mxu0 %v1359_v0 }
 0x3df   :  { %v361_v7 = vpop.f32.mrb[12].mxu0 }
 0x3e0   :  { %v367_v9 = vadd.f32 %v361_v7, %v212_v40  ;;  %v1129_v10 = vpop.f32.mrb[13].mxu0 }
 0x3e1   :  { %v364_v11 = vpop.f32.mrb[14].mxu0 }
 0x3e2   :  { %1237 = vtanh.f32 %v367_v9  ;;  %v1130_v12 = vpop.f32.mrb[15].mxu0  ;;  %v1038_v14 = vmul.f32 -1.442695, %v367_v9 }
 0x3e4   :  { %1239 = vpow2.f32 %v1038_v14 }
 0x3ec   :  { %v1238_v13 = vpop.eup %1237 }
 0x3ed   :  { %377 = vrot.lane.b32.xlu0 %v1238_v13, %s1357_s29 }
 0x3ee   :  { %v1240_v16 = vpop.eup %1239 }
 0x3ef   :  { %v371_v17 = vadd.f32 1.0, %v1240_v16 }
 0x3f1   :  { %1241 = vrcp.f32 %v371_v17 }
 0x3fb   :  { %v1242_v18 = vpop.eup %1241 }
 0x3fc   :  { %v375_v21 = vmul.f32 %v1242_v18, %v313_v1 }
 0x45f   :  { %v378_v19 = vpop.permute.xlu0 %377 }
 0x460   :  { %v380_v20 = vmul.f32 %v1242_v18, %v378_v19 }
 0x462   :  { %382 = vrot.lane.b32.xlu1 %v380_v20, %s1362_s0 }
 0x4d4   :  { %v383_v22 = vpop.permute.xlu1 %382 }
 0x4d5   :  { %v385_v23 = vadd.f32 %v383_v22, %v375_v21 }
 0x4d7   :  { %1243 = vtanh.f32 %v385_v23 }
 0x4e1   :  { %v1244_v24 = vpop.eup %1243 }
 0x4e2   :  { %388 = vrot.lane.b32.xlu0 %v1244_v24, %s1357_s29 }
 0x554   :  { %v389_v25 = vpop.permute.xlu0 %388 }
 0x555   :  { %v391_v26 = vmul.f32 %v1242_v18, %v389_v25 }
 0x557   :  { %v392_v27 = vpack.c.bf16 %v391_v26, %v391_v26 }
 0x559   :  { %394 = vrot.lane.b32.xlu1 %v392_v27, %s1362_s0 }
 0x5cb   :  { %v395_v28 = vpop.permute.xlu1 %394 }
 0x5cc   :  { %1136 = vmatmul.mubr.msk.bf16.vlgmr.msra.gmra.mrb[16].mxu0 %vm251_vm3, %v395_v28 }
 0x5cd   :  { %1148 = vmatpush3.bf16.msra.mxu0 %v1467_v8  ;;  %1151 = vmatprep.mubr.msk.bf16.mxu0 %vm1360_vm1, %v1359_v0 }
 0x5ce   :  { %1149 = vmatprep.subr.bf16.mxu0 %v1359_v0 }
 0x5d1   :  { %1150 = vmatpush3.bf16.msra.mxu0 %v1496_v15 }
 0x5d2   :  { %1163 = vmatprep.subr.bf16.mxu0 %v1359_v0 }
 0x69f   :  { %v433_v29 = vpop.f32.mrb[16].mxu0 }
 0x6a0   :  { %v439_v30 = vadd.f32 %v433_v29, %v1535_v35  ;;  %v1137_v31 = vpop.f32.mrb[17].mxu0 }
 0x6a1   :  { %v436_v32 = vpop.f32.mrb[18].mxu0 }
 0x6a2   :  { %1245 = vtanh.f32 %v439_v30  ;;  %v1138_v33 = vpop.f32.mrb[19].mxu0  ;;  %v1040_v36 = vmul.f32 -1.442695, %v439_v30 }
 0x6a4   :  { %1247 = vpow2.f32 %v1040_v36 }
 0x6ac   :  { %v1246_v34 = vpop.eup %1245 }
 0x6ad   :  { %449 = vrot.lane.b32.xlu0 %v1246_v34, %s1357_s29 }
 0x6ae   :  { %v1248_v37 = vpop.eup %1247 }
 0x6af   :  { %v443_v39 = vadd.f32 1.0, %v1248_v37 }
 0x6b1   :  { %1249 = vrcp.f32 %v443_v39 }
 0x6bb   :  { %v1250_v40 = vpop.eup %1249 }
 0x6bc   :  { %v447_v45 = vmul.f32 %v1250_v40, %v385_v23 }
 0x71f   :  { %v450_v41 = vpop.permute.xlu0 %449 }
 0x720   :  { %v452_v43 = vmul.f32 %v1250_v40, %v450_v41 }
 0x722   :  { %454 = vrot.lane.b32.xlu1 %v452_v43, %s1362_s0 }
 0x794   :  { %v455_v47 = vpop.permute.xlu1 %454 }
 0x795   :  { %v457_v35 = vadd.f32 %v455_v47, %v447_v45 }
 0x797   :  { %1251 = vtanh.f32 %v457_v35 }
 0x7a1   :  { %v1252_v49 = vpop.eup %1251 }
 0x7a2   :  { %460 = vrot.lane.b32.xlu0 %v1252_v49, %s1357_s29 }
 0x814   :  { %v461_v50 = vpop.permute.xlu0 %460 }
 0x815   :  { %v463_v51 = vmul.f32 %v1250_v40, %v461_v50 }
 0x817   :  { %v464_v52 = vpack.c.bf16 %v463_v51, %v463_v51 }
 0x819   :  { %466 = vrot.lane.b32.xlu1 %v464_v52, %s1362_s0 }
 0x88b   :  { %v467_v53 = vpop.permute.xlu1 %466 }
 0x88c   :  { %1144 = vmatmul.mubr.msk.bf16.vlgmr.msra.gmra.mrb[0].mxu1 %vm251_vm3, %v467_v53 }
 0x88d   :  { %1156 = vmatpush3.bf16.msra.mxu1 %v1467_v8  ;;  %1159 = vmatprep.mubr.msk.bf16.mxu1 %vm1360_vm1, %v1359_v0 }
 0x88e   :  { %1157 = vmatprep.subr.bf16.mxu1 %v1359_v0 }
 0x891   :  { %1158 = vmatpush3.bf16.msra.mxu1 %v1496_v15 }
 0x892   :  { %1171 = vmatprep.subr.bf16.mxu1 %v1359_v0 }
 0x95f   :  { %v505_v54 = vpop.f32.mrb[0].mxu1 }
 0x960   :  { %v511_v55 = vadd.f32 %v505_v54, %v1537_v38  ;;  %v1145_v56 = vpop.f32.mrb[1].mxu1 }
 0x961   :  { %v508_v57 = vpop.f32.mrb[2].mxu1 }
 0x962   :  { %1253 = vtanh.f32 %v511_v55  ;;  %v1146_v58 = vpop.f32.mrb[3].mxu1  ;;  %v1042_v60 = vmul.f32 -1.442695, %v511_v55 }
 0x964   :  { %1255 = vpow2.f32 %v1042_v60 }
 0x96c   :  { %v1254_v59 = vpop.eup %1253 }
 0x96d   :  { %521 = vrot.lane.b32.xlu0 %v1254_v59, %s1357_s29 }
 0x96e   :  { %v1256_v61 = vpop.eup %1255 }
 0x96f   :  { %v515_v62 = vadd.f32 1.0, %v1256_v61 }
 0x971   :  { %1257 = vrcp.f32 %v515_v62 }
 0x97b   :  { %v1258_v63 = vpop.eup %1257 }
 0x97c   :  { %v519_v3 = vmul.f32 %v1258_v63, %v457_v35 }
 0x9df   :  { %v522_v1 = vpop.permute.xlu0 %521 }
 0x9e0   :  { %v524_v2 = vmul.f32 %v1258_v63, %v522_v1 }
 0x9e2   :  { %526 = vrot.lane.b32.xlu1 %v524_v2, %s1362_s0 }
 0xa54   :  { %v527_v4 = vpop.permute.xlu1 %526 }
 0xa55   :  { %v529_v38 = vadd.f32 %v527_v4, %v519_v3 }
 0xa57   :  { %1259 = vtanh.f32 %v529_v38 }
 0xa61   :  { %v1260_v5 = vpop.eup %1259 }
 0xa62   :  { %532 = vrot.lane.b32.xlu0 %v1260_v5, %s1357_s29 }
 0xad4   :  { %v533_v6 = vpop.permute.xlu0 %532 }
 0xad5   :  { %v535_v7 = vmul.f32 %v1258_v63, %v533_v6 }
 0xad7   :  { %v536_v9 = vpack.c.bf16 %v535_v7, %v535_v7 }
 0xad9   :  { %538 = vrot.lane.b32.xlu1 %v536_v9, %s1362_s0 }
 0xb4b   :  { %v539_v10 = vpop.permute.xlu1 %538 }
 0xb4c   :  { %1152 = vmatmul.mubr.msk.bf16.vlgmr.msra.gmra.mrb[20].mxu0 %vm251_vm3, %v539_v10 }
 0xb4d   :  { %1164 = vmatpush3.bf16.msra.mxu0 %v1467_v8  ;;  %1167 = vmatprep.mubr.msk.bf16.mxu0 %vm1360_vm1, %v1359_v0 }
 0xb4e   :  { %1165 = vmatprep.subr.bf16.mxu0 %v1359_v0 }
 0xb51   :  { %1166 = vmatpush3.bf16.msra.mxu0 %v1496_v15 }
 0xb52   :  { %1179 = vmatprep.subr.bf16.mxu0 %v1359_v0 }
 0xc1f   :  { %v577_v11 = vpop.f32.mrb[20].mxu0 }
 0xc20   :  { %v583_v12 = vadd.f32 %v577_v11, %v1541_v44  ;;  %v1153_v13 = vpop.f32.mrb[21].mxu0 }
 0xc21   :  { %v580_v14 = vpop.f32.mrb[22].mxu0 }
 0xc22   :  { %1261 = vtanh.f32 %v583_v12  ;;  %v1154_v16 = vpop.f32.mrb[23].mxu0  ;;  %v1044_v18 = vmul.f32 -1.442695, %v583_v12 }
 0xc24   :  { %1263 = vpow2.f32 %v1044_v18 }
 0xc2c   :  { %v1262_v17 = vpop.eup %1261 }
 0xc2d   :  { %593 = vrot.lane.b32.xlu0 %v1262_v17, %s1357_s29 }
 0xc2e   :  { %v1264_v19 = vpop.eup %1263 }
 0xc2f   :  { %v587_v20 = vadd.f32 1.0, %v1264_v19 }
 0xc31   :  { %1265 = vrcp.f32 %v587_v20 }
 0xc3b   :  { %v1266_v21 = vpop.eup %1265 }
 0xc3c   :  { %v591_v24 = vmul.f32 %v1266_v21, %v529_v38 }
 0xc9f   :  { %v594_v22 = vpop.permute.xlu0 %593 }
 0xca0   :  { %v596_v23 = vmul.f32 %v1266_v21, %v594_v22 }
 0xca2   :  { %598 = vrot.lane.b32.xlu1 %v596_v23, %s1362_s0 }
 0xd14   :  { %v599_v25 = vpop.permute.xlu1 %598 }
 0xd15   :  { %v601_v44 = vadd.f32 %v599_v25, %v591_v24  ;;  %v1219_v24 = vld [vmem:[#allocation5 + $0x18] sm:$0xff]   ;;  %v1220_v25 = vld [vmem:[#allocation5 + $0x20] sm:$0xff]  }
 0xd17   :  { %1267 = vtanh.f32 %v601_v44 }
 0xd21   :  { %v1268_v26 = vpop.eup %1267 }
 0xd22   :  { %604 = vrot.lane.b32.xlu0 %v1268_v26, %s1357_s29  ;;  %v1221_v26 = vld [vmem:[#allocation5 + $0x28] sm:$0xff]  }
 0xd94   :  { %v605_v27 = vpop.permute.xlu0 %604 }
 0xd95   :  { %v607_v28 = vmul.f32 %v1266_v21, %v605_v27  ;;  %v1222_v27 = vld [vmem:[#allocation5 + $0x30] sm:$0xff]  }
 0xd97   :  { %v608_v29 = vpack.c.bf16 %v607_v28, %v607_v28  ;;  %v1223_v28 = vld [vmem:[#allocation5 + $0x38] sm:$0xff]  }
 0xd99   :  { %610 = vrot.lane.b32.xlu1 %v608_v29, %s1362_s0 }
 0xe0b   :  { %v611_v30 = vpop.permute.xlu1 %610 }
 0xe0c   :  { %1160 = vmatmul.mubr.msk.bf16.vlgmr.msra.gmra.mrb[4].mxu1 %vm251_vm3, %v611_v30 }
 0xe0d   :  { %1172 = vmatpush3.bf16.msra.mxu1 %v1467_v8  ;;  %1175 = vmatprep.mubr.msk.bf16.mxu1 %vm1360_vm1, %v1359_v0 }
 0xe0e   :  { %1173 = vmatprep.subr.bf16.mxu1 %v1359_v0 }
 0xe11   :  { %1174 = vmatpush3.bf16.msra.mxu1 %v1496_v15 }
 0xe12   :  { %1187 = vmatprep.subr.bf16.mxu1 %v1359_v0 }
 0xedf   :  { %v649_v31 = vpop.f32.mrb[4].mxu1 }
 0xee0   :  { %v655_v32 = vadd.f32 %v649_v31, %v1545_v48  ;;  %v1161_v33 = vpop.f32.mrb[5].mxu1  ;;  %v1224_v31 = vld [vmem:[#allocation5 + $0x40] sm:$0xff]  }
 0xee1   :  { %v652_v34 = vpop.f32.mrb[6].mxu1  ;;  %v1225_v33 = vld [vmem:[#allocation5 + $0x48] sm:$0xff]  }
 0xee2   :  { %1269 = vtanh.f32 %v655_v32  ;;  %v1162_v36 = vpop.f32.mrb[7].mxu1  ;;  %v1046_v8 = vmul.f32 -1.442695, %v655_v32  ;;  %v1226_v34 = vld [vmem:[#allocation5 + $0x50] sm:$0xff]  }
 0xee4   :  { %1271 = vpow2.f32 %v1046_v8  ;;  %v1228_v8 = vld [vmem:[#allocation5 + $0x60] sm:$0xff]  }
 0xeec   :  { %v1270_v37 = vpop.eup %1269 }
 0xeed   :  { %665 = vrot.lane.b32.xlu0 %v1270_v37, %s1357_s29  ;;  %v1227_v37 = vld [vmem:[#allocation5 + $0x58] sm:$0xff]  }
 0xeee   :  { %v1272_v39 = vpop.eup %1271 }
 0xeef   :  { %v659_v40 = vadd.f32 1.0, %v1272_v39  ;;  %v1051_v39 = vld [vmem:[%s1656_s3 + $0x1] ss:$0 sm:$0xff] }
 0xef1   :  { %1273 = vrcp.f32 %v659_v40 }
 0xefb   :  { %v1274_v41 = vpop.eup %1273 }
 0xefc   :  { %v663_v45 = vmul.f32 %v1274_v41, %v601_v44 }
 0xf5f   :  { %v666_v43 = vpop.permute.xlu0 %665 }
 0xf60   :  { %v668_v15 = vmul.f32 %v1274_v41, %v666_v43 }
 0xf62   :  { %670 = vrot.lane.b32.xlu1 %v668_v15, %s1362_s0 }
 0xfd4   :  { %v671_v47 = vpop.permute.xlu1 %670 }
 0xfd5   :  { %v673_v48 = vadd.f32 %v671_v47, %v663_v45 }
 0xfd7   :  { %1275 = vtanh.f32 %v673_v48 }
 0xfe1   :  { %v1276_v35 = vpop.eup %1275 }
 0xfe2   :  { %676 = vrot.lane.b32.xlu0 %v1276_v35, %s1357_s29  ;;  %v1055_v35 = vld [vmem:[%s1656_s3 + $0x2] ss:$0 sm:$0xff] }
0x1054   :  { %v677_v49 = vpop.permute.xlu0 %676 }
0x1055   :  { %v679_v50 = vmul.f32 %v1274_v41, %v677_v49 }
0x1057   :  { %v680_v51 = vpack.c.bf16 %v679_v50, %v679_v50 }
0x1059   :  { %682 = vrot.lane.b32.xlu1 %v680_v51, %s1362_s0 }
0x10cb   :  { %v683_v52 = vpop.permute.xlu1 %682 }
0x10cc   :  { %1168 = vmatmul.mubr.msk.bf16.vlgmr.msra.gmra.mrb[24].mxu0 %vm251_vm3, %v683_v52 }
0x10cd   :  { %1183 = vmatprep.mubr.msk.bf16.mxu0 %vm1360_vm1, %v1359_v0  ;;  %1180 = vmatpush3.bf16.msra.mxu0 %v1219_v24 }
0x10ce   :  { %1181 = vmatprep.subr.bf16.mxu0 %v1359_v0 }
0x10d1   :  { %1182 = vmatpush3.bf16.msra.mxu0 %v1220_v25 }
0x119f   :  { %v721_v53 = vpop.f32.mrb[24].mxu0 }
0x11a0   :  { %v727_v54 = vadd.f32 %v721_v53, %v1539_v42  ;;  %v1169_v55 = vpop.f32.mrb[25].mxu0 }
0x11a1   :  { %v724_v56 = vpop.f32.mrb[26].mxu0 }
0x11a2   :  { %1277 = vtanh.f32 %v727_v54  ;;  %v1170_v57 = vpop.f32.mrb[27].mxu0  ;;  %v1048_v59 = vmul.f32 -1.442695, %v727_v54 }
0x11a4   :  { %1279 = vpow2.f32 %v1048_v59 }
0x11ac   :  { %v1278_v58 = vpop.eup %1277 }
0x11ad   :  { %737 = vrot.lane.b32.xlu0 %v1278_v58, %s1357_s29 }
0x11ae   :  { %v1280_v60 = vpop.eup %1279 }
0x11af   :  { %v731_v61 = vadd.f32 1.0, %v1280_v60 }
0x11b1   :  { %1281 = vrcp.f32 %v731_v61 }
0x11bb   :  { %v1282_v62 = vpop.eup %1281 }
0x11bc   :  { %v735_v2 = vmul.f32 %v1282_v62, %v673_v48 }
0x121f   :  { %v738_v63 = vpop.permute.xlu0 %737 }
0x1220   :  { %v740_v1 = vmul.f32 %v1282_v62, %v738_v63 }
0x1222   :  { %742 = vrot.lane.b32.xlu1 %v740_v1, %s1362_s0 }
0x1294   :  { %v743_v3 = vpop.permute.xlu1 %742 }
0x1295   :  { %v745_v42 = vadd.f32 %v743_v3, %v735_v2 }
0x1297   :  { %1283 = vtanh.f32 %v745_v42 }
0x12a1   :  { %v1284_v4 = vpop.eup %1283 }
0x12a2   :  { %748 = vrot.lane.b32.xlu0 %v1284_v4, %s1357_s29 }
0x1314   :  { %v749_v38 = vpop.permute.xlu0 %748 }
0x1315   :  { %v751_v5 = vmul.f32 %v1282_v62, %v749_v38 }
0x1317   :  { %v752_v6 = vpack.c.bf16 %v751_v5, %v751_v5 }
0x1319   :  { %754 = vrot.lane.b32.xlu1 %v752_v6, %s1362_s0 }
0x138b   :  { %v755_v7 = vpop.permute.xlu1 %754 }
0x138c   :  { %1176 = vmatmul.mubr.msk.bf16.vlgmr.msra.gmra.mrb[8].mxu1 %vm251_vm3, %v755_v7 }
0x138d   :  { %1203 = vmatprep.mubr.msk.bf16.mxu1 %vm1360_vm1, %v1359_v0  ;;  %1188 = vmatpush3.bf16.msra.mxu1 %v1221_v26 }
0x138e   :  { %1189 = vmatprep.subr.bf16.mxu1 %v1359_v0 }
0x1391   :  { %1190 = vmatpush3.bf16.msra.mxu1 %v1222_v27 }
0x1392   :  { %1191 = vmatprep.subr.bf16.mxu1 %v1359_v0 }
0x1395   :  { %1192 = vmatpush3.bf16.msra.mxu1 %v1223_v28 }
0x1396   :  { %1193 = vmatprep.subr.bf16.mxu1 %v1359_v0 }
0x1399   :  { %1194 = vmatpush3.bf16.msra.mxu1 %v1224_v31 }
0x139a   :  { %1195 = vmatprep.subr.bf16.mxu1 %v1359_v0 }
0x139d   :  { %1196 = vmatpush3.bf16.msra.mxu1 %v1225_v33 }
0x139e   :  { %1197 = vmatprep.subr.bf16.mxu1 %v1359_v0 }
0x13a1   :  { %1198 = vmatpush3.bf16.msra.mxu1 %v1226_v34 }
0x13a2   :  { %1199 = vmatprep.subr.bf16.mxu1 %v1359_v0 }
0x13a5   :  { %1200 = vmatpush3.bf16.msra.mxu1 %v1227_v37 }
0x13a6   :  { %1201 = vmatprep.subr.bf16.mxu1 %v1359_v0 }
0x13a9   :  { %1202 = vmatpush3.bf16.msra.mxu1 %v1228_v8 }
0x145f   :  { %v793_v9 = vpop.f32.mrb[8].mxu1 }
0x1460   :  { %v799_v10 = vadd.f32 %v793_v9, %v1543_v46  ;;  %v1177_v11 = vpop.f32.mrb[9].mxu1 }
0x1461   :  { %v796_v12 = vpop.f32.mrb[10].mxu1 }
0x1462   :  { %1285 = vtanh.f32 %v799_v10  ;;  %v1178_v13 = vpop.f32.mrb[11].mxu1  ;;  %v1050_v16 = vmul.f32 -1.442695, %v799_v10 }
0x1464   :  { %1287 = vpow2.f32 %v1050_v16 }
0x146c   :  { %v1286_v14 = vpop.eup %1285 }
0x146d   :  { %809 = vrot.lane.b32.xlu0 %v1286_v14, %s1357_s29 }
0x146e   :  { %v1288_v17 = vpop.eup %1287 }
0x146f   :  { %v803_v18 = vadd.f32 1.0, %v1288_v17 }
0x1471   :  { %1289 = vrcp.f32 %v803_v18 }
0x147b   :  { %v1290_v19 = vpop.eup %1289 }
0x147c   :  { %v807_v22 = vmul.f32 %v1290_v19, %v745_v42 }
0x14df   :  { %v810_v20 = vpop.permute.xlu0 %809 }
0x14e0   :  { %v812_v21 = vmul.f32 %v1290_v19, %v810_v20 }
0x14e2   :  { %814 = vrot.lane.b32.xlu1 %v812_v21, %s1362_s0 }
0x1554   :  { %v815_v23 = vpop.permute.xlu1 %814 }
0x1555   :  { %v817_v46 = vadd.f32 %v815_v23, %v807_v22 }
0x1557   :  { %1291 = vtanh.f32 %v817_v46 }
0x1561   :  { %v1292_v44 = vpop.eup %1291 }
0x1562   :  { %820 = vrot.lane.b32.xlu0 %v1292_v44, %s1357_s29 }
0x15d4   :  { %v821_v29 = vpop.permute.xlu0 %820 }
0x15d5   :  { %v823_v30 = vmul.f32 %v1290_v19, %v821_v29 }
0x15d7   :  { %v824_v32 = vpack.c.bf16 %v823_v30, %v823_v30 }
0x15d9   :  { %830 = vrot.lane.b32.xlu1 %v824_v32, %s1362_s0 }
0x164b   :  { %v831_v36 = vpop.permute.xlu1 %830 }
0x164c   :  { %1184 = vmatmul.mubr.msk.bf16.vlgmr.msra.gmra.mrb[28].mxu0 %vm251_vm3, %v831_v36 }
0x171f   :  { %v881_v40 = vpop.f32.mrb[28].mxu0 }
0x1720   :  { %v882_v41 = vadd.f32 %v1051_v39, %v881_v40  ;;  %v1185_v43 = vpop.f32.mrb[29].mxu0 }
0x1721   :  { %v884_v15 = vpop.f32.mrb[30].mxu0 }
0x1722   :  { %v887_v45 = vmax.f32 %v882_v41, 0.0  ;;  %v1186_v47 = vpop.f32.mrb[31].mxu0 }
0x1724   :  { %v888_v48 = vpack.c.bf16 %v887_v45, %v887_v45 }
0x1726   :  { %1204 = vmatmul.mubr.bf16.vlgmr.msra.gmra.mrb[12].mxu1 %v888_v48 }
0x17f9   :  { %v975_v0 = vpop.f32.mrb[12].mxu1 }
0x17fa   :  { %v976_v49 = vadd.f32 %v1055_v35, %v975_v0  ;;  %v1205_v50 = vpop.f32.mrb[13].mxu1 }
0x17fb   :  { %v978_v51 = vpop.f32.mrb[14].mxu1 }
0x17fc   :  { %981 = vst [vmem:[#allocation8] sm:$0xff] %v976_v49  ;;  %v1206_v52 = vpop.f32.mrb[15].mxu1 }
0x17fd   :  { %1338 = shalt.err (!%p1335_p3)
}
0x17fe   :  { %s1339_s3 = scalar_lea.hbm %s1657_s4, 128 }
0x17ff   :  { %p1340_p4 = scmp.ne.s32.totalorder %s1657_s4, %s1339_s3  ;;  %p1343_p5 = scmp.lt.u32.totalorder %s1339_s3, %s1657_s4 }
0x1801   :  { %p1345_p6 = pnand %p1343_p5, %p1340_p4 }
0x1803   :  { %1348 = shalt.err (!%p1345_p6)
}
0x1804   :  { %991 = dma.vmem_to_hbm [thread:$0]  %s989_s25, 128, %s1657_s4, [#allocation7]  }
0x1805   :  { %1353 = dma.done.wait [#allocation7], 128  }
0x1806   :  { %1354 = vsyncadd [#allocation7], 4294967168 }
0x1807   :  { %995 = vsyncpa [#allocation6], 1 }
0x1808   :  { %996 = vsyncpa [#allocation7], 1 }

</bundles_post_ra>
